<compile_context>
chip_gen: v7x
topology: tpu7x:2x2x1
jax: 0.10.0
libtpu: 0.0.40
codegen_flags: <defaults>
</compile_context>

<pallas_src>
import math
import jax
import jax.numpy as jnp
from jax.experimental import pallas as pl
from jax.experimental.pallas import tpu as pltpu


def _round_up(x, m):
    return ((x + m - 1) // m) * m


# ---------------------------------------------------------------------------
# Fused kernel: N LSTMCell layers + final Linear (grid axis = layer index)
# ---------------------------------------------------------------------------
def _fused_lstm_kernel(hin0_ref,                     # (Bp, Hp)  embedded input
                       h0_ref, c0_ref,               # (1, Bp, Hp) per layer
                       w_ref, b_ref,                 # (1, 2Hp, 4Hp), (1, 1, 4Hp)
                       lw_ref, lb_ref,               # (Hp, Op), (1, Op)
                       h_out_ref, c_out_ref,         # (1, Bp, Hp) per layer
                       logits_ref,                   # (Bp, Op)
                       hin_ref):                     # VMEM scratch (Bp, Hp)
    n = pl.program_id(0)
    num_layers = pl.num_programs(0)
    Bp, Hp = hin_ref.shape
    w_dtype = w_ref.dtype

    # Layer 0 input comes from the embedded tokens; later layers read the
    # hidden state carried in the VMEM scratch.
    @pl.when(n == 0)
    def _():
        hin_ref[...] = hin0_ref[...]

    x = hin_ref[...]                                 # f32
    h = h0_ref[0]                                    # f32
    c = c0_ref[0]                                    # f32 cell state

    # Single fused gate matmul over K = 2*Hp, f32 accumulation on the MXU.
    xh = jnp.concatenate([x, h], axis=-1).astype(w_dtype)        # (Bp, 2Hp)
    gates = (jnp.dot(xh, w_ref[0], preferred_element_type=jnp.float32)
             + b_ref[0])                                         # (Bp, 4Hp)

    # Gate order was permuted to (i, f, o, g) at prepare time: one sigmoid
    # over the first 3 gate blocks, one tanh over the last.
    sig = jax.nn.sigmoid(gates[:, :3 * Hp])
    g_g = jnp.tanh(gates[:, 3 * Hp:])
    i_g = sig[:, 0 * Hp:1 * Hp]
    f_g = sig[:, 1 * Hp:2 * Hp]
    o_g = sig[:, 2 * Hp:3 * Hp]

    c_new = f_g * c + i_g * g_g
    h_new = o_g * jnp.tanh(c_new)

    h_out_ref[0] = h_new
    c_out_ref[0] = c_new
    hin_ref[...] = h_new                             # carry to next layer

    # Fused final Linear on the last layer's hidden state.
    @pl.when(n == num_layers - 1)
    def _():
        logits_ref[...] = (
            jnp.dot(h_new.astype(w_dtype), lw_ref[...],
                    preferred_element_type=jnp.float32)
            + lb_ref[...])


# ---------------------------------------------------------------------------
# Parameter preparation (done ONCE, outside the per-step forward)
# ---------------------------------------------------------------------------
_GATE_ORDER = (0, 1, 3, 2)        # PyTorch (i, f, g, o) -> kernel (i, f, o, g)


def _pack_gate_weight(w, H, Hp):
    """(4H, H) PyTorch LSTM weight -> (Hp, 4*Hp) transposed, gate-reordered,
    gate-block zero-padded."""
    w4 = w.reshape(4, H, H)[jnp.array(_GATE_ORDER)]   # (gate, out, in)
    wt = jnp.transpose(w4, (2, 0, 1))                 # (in, gate, out)
    wt = jnp.pad(wt, ((0, Hp - H), (0, 0), (0, Hp - H)))
    return wt.reshape(Hp, 4 * Hp)


def prepare_params(params, weights_dtype=jnp.bfloat16):
    """Pad / transpose / reorder / stack PyTorch-layout params once.

    bf16 weights (default) halve HBM traffic and weight VMEM on v5e/v6e/v7x;
    the kernel keeps f32 accumulation, f32 cell state and f32 bias.  Use
    weights_dtype=jnp.float32 for bit-tight comparisons against an f32 ref.
    """
    emb = params["embedding"]
    V, H = emb.shape
    O = params["linear_w"].shape[0]
    N = len(params["layers"])
    # Keep 4*Hp lane-dense (multiple of 128) without inflating small H to 128.
    Hp = _round_up(H, 32) if H < 128 else _round_up(H, 128)
    Op = _round_up(O, 128)

    emb_p = jnp.pad(emb, ((0, 0), (0, Hp - H))).astype(jnp.float32)

    w_stacked, bias = [], []
    for lp in params["layers"]:
        w_ih_t = _pack_gate_weight(lp["w_ih"], H, Hp)
        w_hh_t = _pack_gate_weight(lp["w_hh"], H, Hp)
        # Stack along K so a single [x, h] @ W matmul computes all gates.
        w_stacked.append(jnp.concatenate([w_ih_t, w_hh_t], axis=0))  # (2Hp,4Hp)
        b = (lp["b_ih"] + lp["b_hh"]).reshape(4, H)[jnp.array(_GATE_ORDER)]
        b = jnp.pad(b, ((0, 0), (0, Hp - H))).reshape(1, 4 * Hp)
        bias.append(b)

    return {
        "emb": emb_p,                                              # (V, Hp) f32
        "w": jnp.stack(w_stacked).astype(weights_dtype),           # (N, 2Hp, 4Hp)
        "bias": jnp.stack(bias).astype(jnp.float32),               # (N, 1, 4Hp)
        "lw_t": jnp.pad(params["linear_w"].T,
                        ((0, Hp - H), (0, Op - O))).astype(weights_dtype),
        "lb": jnp.pad(params["linear_b"], (0, Op - O)
                      ).reshape(1, Op).astype(jnp.float32),
        "H": H, "O": O, "N": N, "Hp": Hp, "Op": Op,
    }


# ---------------------------------------------------------------------------
# Forward pass (matches LSTModel.forward semantics)
# ---------------------------------------------------------------------------
def lst_model_forward(prepared, x_ids, last_states=None):
    """x_ids: (B,) int token ids.  Returns (output (B,O), [(h,c)] * n_layers)."""
    H, O, N = prepared["H"], prepared["O"], prepared["N"]
    Hp, Op = prepared["Hp"], prepared["Op"]
    B = x_ids.shape[0]
    Bp = _round_up(max(B, 8), 8)

    # Embedding lookup hoisted out of the kernel (single XLA gather), then
    # padded to TPU-friendly (Bp, Hp).
    hin0 = jnp.zeros((Bp, Hp), jnp.float32)
    hin0 = hin0.at[:B].set(jnp.take(prepared["emb"], x_ids.astype(jnp.int32),
                                    axis=0))

    h0 = jnp.zeros((N, Bp, Hp), jnp.float32)
    c0 = jnp.zeros((N, Bp, Hp), jnp.float32)
    if last_states is not None:
        assert len(last_states) == N
        for n, (h, c) in enumerate(last_states):
            h0 = h0.at[n, :B, :H].set(h.astype(jnp.float32))
            c0 = c0.at[n, :B, :H].set(c.astype(jnp.float32))

    grid_spec = pltpu.PrefetchScalarGridSpec(
        num_scalar_prefetch=0,
        grid=(N,),                      # sequential layer axis (state carry)
        in_specs=[
            pl.BlockSpec((Bp, Hp), lambda n: (0, 0)),              # hin0
            pl.BlockSpec((1, Bp, Hp), lambda n: (n, 0, 0)),        # h0 per layer
            pl.BlockSpec((1, Bp, Hp), lambda n: (n, 0, 0)),        # c0 per layer
            pl.BlockSpec((1, 2 * Hp, 4 * Hp), lambda n: (n, 0, 0)),  # fused W
            pl.BlockSpec((1, 1, 4 * Hp), lambda n: (n, 0, 0)),     # bias
            pl.BlockSpec((Hp, Op), lambda n: (0, 0)),              # linear w_t
            pl.BlockSpec((1, Op), lambda n: (0, 0)),               # linear b
        ],
        out_specs=[
            pl.BlockSpec((1, Bp, Hp), lambda n: (n, 0, 0)),        # h per layer
            pl.BlockSpec((1, Bp, Hp), lambda n: (n, 0, 0)),        # c per layer
            pl.BlockSpec((Bp, Op), lambda n: (0, 0)),              # logits
        ],
        scratch_shapes=[
            pltpu.VMEM((Bp, Hp), jnp.float32),      # hin carried across layers
        ],
    )

    h_all, c_all, logits = pl.pallas_call(
        _fused_lstm_kernel,
        grid_spec=grid_spec,
        out_shape=[jax.ShapeDtypeStruct((N, Bp, Hp), jnp.float32),
                   jax.ShapeDtypeStruct((N, Bp, Hp), jnp.float32),
                   jax.ShapeDtypeStruct((Bp, Op), jnp.float32)],
        compiler_params=pltpu.CompilerParams(
            dimension_semantics=("arbitrary",),     # layer axis carries state
            vmem_limit_bytes=48 * 1024 * 1024),     # fits v7x's 64 MiB too
    )(hin0, h0, c0, prepared["w"], prepared["bias"],
      prepared["lw_t"], prepared["lb"])

    states = [(h_all[n, :B, :H], c_all[n, :B, :H]) for n in range(N)]
    output = logits[:B, :O]
    return output, states


# ---------------------------------------------------------------------------
# Parameter init (PyTorch-equivalent layout) + pure-JAX reference
# ---------------------------------------------------------------------------
def init_params(key, input_size, hidden_size, output_size, n_layers=1):
    ks = jax.random.split(key, 2 + 5 * n_layers)
    params = {}
    params["embedding"] = jax.random.normal(ks[0], (input_size, hidden_size),
                                            jnp.float32)
    stdv = 1.0 / math.sqrt(hidden_size)
    layers = []
    for n in range(n_layers):
        kw = jax.random.split(ks[1 + n], 4)
        layers.append({
            "w_ih": jax.random.uniform(kw[0], (4 * hidden_size, hidden_size),
                                       jnp.float32, -stdv, stdv),
            "w_hh": jax.random.uniform(kw[1], (4 * hidden_size, hidden_size),
                                       jnp.float32, -stdv, stdv),
            "b_ih": jax.random.uniform(kw[2], (4 * hidden_size,),
                                       jnp.float32, -stdv, stdv),
            "b_hh": jax.random.uniform(kw[3], (4 * hidden_size,),
                                       jnp.float32, -stdv, stdv),
        })
    params["layers"] = layers
    kl = jax.random.split(ks[-1], 2)
    lin_std = 1.0 / math.sqrt(hidden_size)
    params["linear_w"] = jax.random.uniform(kl[0], (output_size, hidden_size),
                                            jnp.float32, -lin_std, lin_std)
    params["linear_b"] = jax.random.uniform(kl[1], (output_size,),
                                            jnp.float32, -lin_std, lin_std)
    return params


def _reference_forward(params, x_ids, last_states=None):
    hin = jnp.take(params["embedding"], x_ids, axis=0)
    B, H = hin.shape
    N = len(params["layers"])
    if last_states is None:
        last_states = [(jnp.zeros((B, H), jnp.float32),
                        jnp.zeros((B, H), jnp.float32)) for _ in range(N)]
    states = []
    for lp, (h0, c0) in zip(params["layers"], last_states):
        gates = (hin @ lp["w_ih"].T + lp["b_ih"]
                 + h0 @ lp["w_hh"].T + lp["b_hh"])
        i_g = jax.nn.sigmoid(gates[:, 0:H])
        f_g = jax.nn.sigmoid(gates[:, H:2 * H])
        g_g = jnp.tanh(gates[:, 2 * H:3 * H])
        o_g = jax.nn.sigmoid(gates[:, 3 * H:4 * H])
        c = f_g * c0 + i_g * g_g
        h = o_g * jnp.tanh(c)
        states.append((h, c))
        hin = h
    out = states[-1][0] @ params["linear_w"].T + params["linear_b"]
    return out, states


def _check(out, states, ref_out, ref_states, atol, rtol):
    assert jnp.allclose(out, ref_out, atol=atol, rtol=rtol)
    for (h, c), (rh, rc) in zip(states, ref_states):
        assert jnp.allclose(h, rh, atol=atol, rtol=rtol)
        assert jnp.allclose(c, rc, atol=atol, rtol=rtol)


if __name__ == "__main__":
    input_size = 50      # vocab
    hidden_size = 32
    output_size = 16
    n_layers = 2
    batch = 4

    key = jax.random.PRNGKey(0)
    k_params, k_ids, k_h, k_c = jax.random.split(key, 4)
    params = init_params(k_params, input_size, hidden_size, output_size,
                         n_layers=n_layers)
    x_ids = jax.random.randint(k_ids, (batch,), 0, input_size, jnp.int32)
    warm = [(0.1 * jax.random.normal(jax.random.fold_in(k_h, n),
                                     (batch, hidden_size), jnp.float32),
             0.1 * jax.random.normal(jax.random.fold_in(k_c, n),
                                     (batch, hidden_size), jnp.float32))
            for n in range(n_layers)]

    ref_out, ref_states = _reference_forward(params, x_ids)
    ref_out2, ref_states2 = _reference_forward(params, x_ids, warm)

    # --- f32 weights: bit-tight correctness check (cold + warm start) ------
    prepared_f32 = prepare_params(params, weights_dtype=jnp.float32)
    out, states = lst_model_forward(prepared_f32, x_ids)
    out = jax.block_until_ready(out)
    _check(out, states, ref_out, ref_states, atol=1e-5, rtol=1e-5)

    out2, states2 = lst_model_forward(prepared_f32, x_ids, warm)
    out2 = jax.block_until_ready(out2)
    _check(out2, states2, ref_out2, ref_states2, atol=1e-5, rtol=1e-5)

    # --- bf16 weights (default / recommended perf config): looser tolerance
    prepared_bf16 = prepare_params(params)              # bf16 weights
    out3, states3 = lst_model_forward(prepared_bf16, x_ids)
    out3 = jax.block_until_ready(out3)
    _check(out3, states3, ref_out, ref_states, atol=5e-2, rtol=5e-2)

    print("KERNEL_OK")
</pallas_src>

<mosaic_0001>
module attributes {stable_mosaic.version = 11 : i64} {
  func.func @_fused_lstm_kernel(%arg0: i32, %arg1: memref<8x32xf32, #tpu.memory_space<vmem>>, %arg2: memref<1x8x32xf32, #tpu.memory_space<vmem>>, %arg3: memref<1x8x32xf32, #tpu.memory_space<vmem>>, %arg4: memref<1x64x128xf32, #tpu.memory_space<vmem>>, %arg5: memref<1x1x128xf32, #tpu.memory_space<vmem>>, %arg6: memref<32x128xf32, #tpu.memory_space<vmem>>, %arg7: memref<1x128xf32, #tpu.memory_space<vmem>>, %arg8: memref<1x8x32xf32, #tpu.memory_space<vmem>>, %arg9: memref<1x8x32xf32, #tpu.memory_space<vmem>>, %arg10: memref<8x128xf32, #tpu.memory_space<vmem>>, %arg11: memref<8x32xf32, #tpu.memory_space<vmem>>) attributes {dimension_semantics = [#tpu.dimension_semantics<arbitrary>], iteration_bounds = array<i64: 2>, scalar_prefetch = 0 : i64, scratch_operands = 1 : i64, tpu.core_type = #tpu.core_type<tc>, window_params = [{pipeline_mode = #tpu.pipeline_mode<synchronous>, transform_indices = @transform_0, window_bounds = array<i64: 8, 32>}, {transform_indices = @transform_1, window_bounds = array<i64: 1, 8, 32>}, {transform_indices = @transform_2, window_bounds = array<i64: 1, 8, 32>}, {transform_indices = @transform_3, window_bounds = array<i64: 1, 64, 128>}, {transform_indices = @transform_4, window_bounds = array<i64: 1, 1, 128>}, {pipeline_mode = #tpu.pipeline_mode<synchronous>, transform_indices = @transform_5, window_bounds = array<i64: 32, 128>}, {pipeline_mode = #tpu.pipeline_mode<synchronous>, transform_indices = @transform_6, window_bounds = array<i64: 1, 128>}, {transform_indices = @transform_7, window_bounds = array<i64: 1, 8, 32>}, {transform_indices = @transform_8, window_bounds = array<i64: 1, 8, 32>}, {pipeline_mode = #tpu.pipeline_mode<synchronous>, transform_indices = @transform_9, window_bounds = array<i64: 8, 128>}]} {
    %c0_i32 = arith.constant 0 : i32
    %0 = arith.cmpi eq, %arg0, %c0_i32 : i32
    %1 = arith.extui %0 : i1 to i32
    %c0_i32_0 = arith.constant 0 : i32
    %2 = arith.cmpi ne, %1, %c0_i32_0 : i32
    scf.if %2 {
      %c0_24 = arith.constant 0 : index
      %c0_25 = arith.constant 0 : index
      %42 = vector.load %arg1[%c0_24, %c0_25] : memref<8x32xf32, #tpu.memory_space<vmem>>, vector<8x32xf32>
      %c0_26 = arith.constant 0 : index
      %c0_27 = arith.constant 0 : index
      %43 = vector.load %arg11[%c0_26, %c0_27] : memref<8x32xf32, #tpu.memory_space<vmem>>, vector<8x32xf32>
      tpu.vector_store %arg11[%c0_26, %c0_27], %42 {strides = array<i32>} : memref<8x32xf32, #tpu.memory_space<vmem>>, vector<8x32xf32>,
    } else {
    }
    %c0 = arith.constant 0 : index
    %c0_1 = arith.constant 0 : index
    %3 = vector.load %arg11[%c0, %c0_1] : memref<8x32xf32, #tpu.memory_space<vmem>>, vector<8x32xf32>
    %c0_2 = arith.constant 0 : index
    %c0_3 = arith.constant 0 : index
    %c0_4 = arith.constant 0 : index
    %4 = vector.load %arg2[%c0_2, %c0_3, %c0_4] : memref<1x8x32xf32, #tpu.memory_space<vmem>>, vector<1x8x32xf32>
    %5 = vector.shape_cast %4 : vector<1x8x32xf32> to vector<8x32xf32>
    %c0_5 = arith.constant 0 : index
    %c0_6 = arith.constant 0 : index
    %c0_7 = arith.constant 0 : index
    %6 = vector.load %arg3[%c0_5, %c0_6, %c0_7] : memref<1x8x32xf32, #tpu.memory_space<vmem>>, vector<1x8x32xf32>
    %7 = vector.shape_cast %6 : vector<1x8x32xf32> to vector<8x32xf32>
    %8 = tpu.concatenate %3, %5 in 1 : vector<8x32xf32>, vector<8x32xf32> -> vector<8x64xf32>
    %c0_8 = arith.constant 0 : index
    %c0_9 = arith.constant 0 : index
    %c0_10 = arith.constant 0 : index
    %9 = vector.load %arg4[%c0_8, %c0_9, %c0_10] : memref<1x64x128xf32, #tpu.memory_space<vmem>>, vector<1x64x128xf32>
    %10 = vector.shape_cast %9 : vector<1x64x128xf32> to vector<64x128xf32>
    %cst = arith.constant dense<0.000000e+00> : vector<8x128xf32>
    %11 = tpu.matmul %8, %10, %cst {dimension_numbers = #tpu.dot_dimension_numbers<[1], [0], [0], [1], [0, 0, 1, 1], [], []>} : vector<8x64xf32>, vector<64x128xf32>, vector<8x128xf32> -> vector<8x128xf32>
    %c0_11 = arith.constant 0 : index
    %c0_12 = arith.constant 0 : index
    %c0_13 = arith.constant 0 : index
    %12 = vector.load %arg5[%c0_11, %c0_12, %c0_13] : memref<1x1x128xf32, #tpu.memory_space<vmem>>, vector<1x1x128xf32>
    %13 = vector.shape_cast %12 : vector<1x1x128xf32> to vector<1x128xf32>
    %14 = vector.broadcast %13 : vector<1x128xf32> to vector<8x128xf32>
    %15 = arith.addf %11, %14 : vector<8x128xf32>
    %16 = vector.extract_strided_slice %15 {offsets = [0, 0], sizes = [8, 96], strides = [1, 1]} : vector<8x128xf32> to vector<8x96xf32>
    %17 = arith.negf %16 : vector<8x96xf32>
    %18 = math.exp %17 : vector<8x96xf32>
    %cst_14 = arith.constant 1.000000e+00 : f32
    %19 = vector.broadcast %cst_14 : f32 to vector<8x96xf32>
    %20 = arith.addf %19, %18 : vector<8x96xf32>
    %21 = arith.divf %19, %20 : vector<8x96xf32>
    %22 = vector.extract_strided_slice %15 {offsets = [0, 96], sizes = [8, 32], strides = [1, 1]} : vector<8x128xf32> to vector<8x32xf32>
    %23 = math.tanh %22 : vector<8x32xf32>
    %24 = vector.extract_strided_slice %21 {offsets = [0, 0], sizes = [8, 32], strides = [1, 1]} : vector<8x96xf32> to vector<8x32xf32>
    %25 = vector.extract_strided_slice %21 {offsets = [0, 32], sizes = [8, 32], strides = [1, 1]} : vector<8x96xf32> to vector<8x32xf32>
    %26 = vector.extract_strided_slice %21 {offsets = [0, 64], sizes = [8, 32], strides = [1, 1]} : vector<8x96xf32> to vector<8x32xf32>
    %27 = arith.mulf %25, %7 : vector<8x32xf32>
    %28 = arith.mulf %24, %23 : vector<8x32xf32>
    %29 = arith.addf %27, %28 : vector<8x32xf32>
    %30 = math.tanh %29 : vector<8x32xf32>
    %31 = arith.mulf %26, %30 : vector<8x32xf32>
    %c0_15 = arith.constant 0 : index
    %c0_16 = arith.constant 0 : index
    %c0_17 = arith.constant 0 : index
    %32 = vector.load %arg8[%c0_15, %c0_16, %c0_17] : memref<1x8x32xf32, #tpu.memory_space<vmem>>, vector<1x8x32xf32>
    %33 = vector.shape_cast %32 : vector<1x8x32xf32> to vector<8x32xf32>
    %34 = vector.shape_cast %31 : vector<8x32xf32> to vector<1x8x32xf32>
    tpu.vector_store %arg8[%c0_15, %c0_16, %c0_17], %34 {strides = array<i32>} : memref<1x8x32xf32, #tpu.memory_space<vmem>>, vector<1x8x32xf32>,
    %c0_18 = arith.constant 0 : index
    %c0_19 = arith.constant 0 : index
    %c0_20 = arith.constant 0 : index
    %35 = vector.load %arg9[%c0_18, %c0_19, %c0_20] : memref<1x8x32xf32, #tpu.memory_space<vmem>>, vector<1x8x32xf32>
    %36 = vector.shape_cast %35 : vector<1x8x32xf32> to vector<8x32xf32>
    %37 = vector.shape_cast %29 : vector<8x32xf32> to vector<1x8x32xf32>
    tpu.vector_store %arg9[%c0_18, %c0_19, %c0_20], %37 {strides = array<i32>} : memref<1x8x32xf32, #tpu.memory_space<vmem>>, vector<1x8x32xf32>,
    %c0_21 = arith.constant 0 : index
    %c0_22 = arith.constant 0 : index
    %38 = vector.load %arg11[%c0_21, %c0_22] : memref<8x32xf32, #tpu.memory_space<vmem>>, vector<8x32xf32>
    tpu.vector_store %arg11[%c0_21, %c0_22], %31 {strides = array<i32>} : memref<8x32xf32, #tpu.memory_space<vmem>>, vector<8x32xf32>,
    %c1_i32 = arith.constant 1 : i32
    %39 = arith.cmpi eq, %arg0, %c1_i32 : i32
    %40 = arith.extui %39 : i1 to i32
    %c0_i32_23 = arith.constant 0 : i32
    %41 = arith.cmpi ne, %40, %c0_i32_23 : i32
    scf.if %41 {
      %c0_24 = arith.constant 0 : index
      %c0_25 = arith.constant 0 : index
      %42 = vector.load %arg6[%c0_24, %c0_25] : memref<32x128xf32, #tpu.memory_space<vmem>>, vector<32x128xf32>
      %cst_26 = arith.constant dense<0.000000e+00> : vector<8x128xf32>
      %43 = tpu.matmul %31, %42, %cst_26 {dimension_numbers = #tpu.dot_dimension_numbers<[1], [0], [0], [1], [0, 0, 1, 1], [], []>} : vector<8x32xf32>, vector<32x128xf32>, vector<8x128xf32> -> vector<8x128xf32>
      %c0_27 = arith.constant 0 : index
      %c0_28 = arith.constant 0 : index
      %44 = vector.load %arg7[%c0_27, %c0_28] : memref<1x128xf32, #tpu.memory_space<vmem>>, vector<1x128xf32>
      %45 = vector.broadcast %44 : vector<1x128xf32> to vector<8x128xf32>
      %46 = arith.addf %43, %45 : vector<8x128xf32>
      %c0_29 = arith.constant 0 : index
      %c0_30 = arith.constant 0 : index
      %47 = vector.load %arg10[%c0_29, %c0_30] : memref<8x128xf32, #tpu.memory_space<vmem>>, vector<8x128xf32>
      tpu.vector_store %arg10[%c0_29, %c0_30], %46 {strides = array<i32>} : memref<8x128xf32, #tpu.memory_space<vmem>>, vector<8x128xf32>,
    } else {
    }
    return
  }
  func.func @transform_0(%arg0: i32) -> (i32, i32) {
    %c0_i32 = arith.constant 0 : i32
    %c0_i32_0 = arith.constant 0 : i32
    %c0_i32_1 = arith.constant 0 : i32
    return %c0_i32, %c0_i32_0 : i32, i32
  }
  func.func @transform_1(%arg0: i32) -> (i32, i32, i32) {
    %c0_i32 = arith.constant 0 : i32
    %c0_i32_0 = arith.constant 0 : i32
    %c0_i32_1 = arith.constant 0 : i32
    return %arg0, %c0_i32, %c0_i32_0 : i32, i32, i32
  }
  func.func @transform_2(%arg0: i32) -> (i32, i32, i32) {
    %c0_i32 = arith.constant 0 : i32
    %c0_i32_0 = arith.constant 0 : i32
    %c0_i32_1 = arith.constant 0 : i32
    return %arg0, %c0_i32, %c0_i32_0 : i32, i32, i32
  }
  func.func @transform_3(%arg0: i32) -> (i32, i32, i32) {
    %c0_i32 = arith.constant 0 : i32
    %c0_i32_0 = arith.constant 0 : i32
    %c0_i32_1 = arith.constant 0 : i32
    return %arg0, %c0_i32, %c0_i32_0 : i32, i32, i32
  }
  func.func @transform_4(%arg0: i32) -> (i32, i32, i32) {
    %c0_i32 = arith.constant 0 : i32
    %c0_i32_0 = arith.constant 0 : i32
    %c0_i32_1 = arith.constant 0 : i32
    return %arg0, %c0_i32, %c0_i32_0 : i32, i32, i32
  }
  func.func @transform_5(%arg0: i32) -> (i32, i32) {
    %c0_i32 = arith.constant 0 : i32
    %c0_i32_0 = arith.constant 0 : i32
    %c0_i32_1 = arith.constant 0 : i32
    return %c0_i32, %c0_i32_0 : i32, i32
  }
  func.func @transform_6(%arg0: i32) -> (i32, i32) {
    %c0_i32 = arith.constant 0 : i32
    %c0_i32_0 = arith.constant 0 : i32
    %c0_i32_1 = arith.constant 0 : i32
    return %c0_i32, %c0_i32_0 : i32, i32
  }
  func.func @transform_7(%arg0: i32) -> (i32, i32, i32) {
    %c0_i32 = arith.constant 0 : i32
    %c0_i32_0 = arith.constant 0 : i32
    %c0_i32_1 = arith.constant 0 : i32
    return %arg0, %c0_i32, %c0_i32_0 : i32, i32, i32
  }
  func.func @transform_8(%arg0: i32) -> (i32, i32, i32) {
    %c0_i32 = arith.constant 0 : i32
    %c0_i32_0 = arith.constant 0 : i32
    %c0_i32_1 = arith.constant 0 : i32
    return %arg0, %c0_i32, %c0_i32_0 : i32, i32, i32
  }
  func.func @transform_9(%arg0: i32) -> (i32, i32) {
    %c0_i32 = arith.constant 0 : i32
    %c0_i32_0 = arith.constant 0 : i32
    %c0_i32_1 = arith.constant 0 : i32
    return %c0_i32, %c0_i32_0 : i32, i32
  }
}

</mosaic_0001>

<bundles_post_ra>
// kernel: tpu_custom_call.1
= control target key start
LH: loop header
LB: loop body
LE: loop exit
PB: predicated region body
PF: predicated region fallthrough
CT: control target
= control target key end

     0   :  { %s1911_s0 = inlined_call_operand.hbm [shape: f32[8,32], index: 0, kind: input, shape index: {}]   ;;  %s1912_s1 = inlined_call_operand.hbm [shape: f32[2,8,32], index: 1, kind: input, shape index: {}]   ;;  %s1913_s2 = inlined_call_operand.hbm [shape: f32[2,8,32], index: 2, kind: input, shape index: {}]   ;;  %s1914_s3 = inlined_call_operand.hbm [shape: f32[2,64,128], index: 3, kind: input, shape index: {}]   ;;  %s1915_s4 = inlined_call_operand.vmem [shape: f32[2,1,128], index: 4, kind: input, shape index: {}]   ;;  %s1916_s5 = inlined_call_operand.hbm [shape: f32[32,128], index: 5, kind: input, shape index: {}]   ;;  %s1917_s6 = inlined_call_operand.vmem [shape: f32[1,128], index: 6, kind: input, shape index: {}]   ;;  %s1918_s7 = inlined_call_operand.hbm [shape: f32[2,8,32], index: 7, kind: output, shape index: {0}]   ;;  %s1919_s8 = inlined_call_operand.hbm [shape: f32[2,8,32], index: 8, kind: output, shape index: {1}]   ;;  %s1920_s9 = inlined_call_operand.hbm [shape: f32[8,128], index: 9, kind: output, shape index: {2}]  }
   0x1   :  { %1945 = sst [smem:[#allocation28_spill]] %s1912_s1 }
   0x2   :  { %1946 = sst [smem:[#allocation29_spill]] %s1916_s5 }
   0x3   :  { %1947 = sst [smem:[#allocation30_spill]] %s1917_s6 }
   0x4   :  { %1948 = sst [smem:[#allocation31_spill]] %s1918_s7 }
   0x5   :  { %1949 = sst [smem:[#allocation32_spill]] %s1919_s8 }
   0x6   :  { %1950 = sst [smem:[#allocation33_spill]] %s1920_s9 }
   0x7   :  { %15 = vsyncpa [#allocation4], 0 }
   0x8   :  { %16 = vsyncpa [#allocation7], 0 }
   0x9   :  { %18 = vsyncpa [#allocation7 + $0x1], 0 }
   0xa   :  { %19 = vsyncpa [#allocation10], 0 }
   0xb   :  { %21 = vsyncpa [#allocation10 + $0x1], 0 }
   0xc   :  { %22 = vsyncpa [#allocation5], 0 }
   0xd   :  { %24 = vsyncpa [#allocation5 + $0x1], 0 }
   0xe   :  { %25 = vsyncpa [#allocation14], 0 }
   0xf   :  { %27 = vsyncpa [#allocation14 + $0x1], 0  ;;  %s1494_s30 = smov 0   ;;  %s1496_s10 = smov 0  }
  0x10   :  { %s1498_s11 = smov 0   ;;  %s1500_s12 = smov 0  }
  0x11 LB: > { %1951 = sst [smem:[#allocation23_spill]] %s1411_s30  ;;  %s1515_s13 = sadd.s32 4294967295, %s1423_s12   ;;  %s1423_s12 = sphi %s1500_s12, %s1999_s12   ;;  %s1419_s11 = sphi %s1498_s11, %s2003_s11   ;;  %s1415_s10 = sphi %s1496_s10, %s2002_s10   ;;  %s1411_s30 = sphi %s1494_s30, %s2001_s30  }
  0x12   : > { %s1922_s14 = sadd.s32 4294967294, %s1423_s12   ;;  %p74_p0 = scmp.ne.s32.totalorder %s1415_s10, %s1411_s30 }
  0x13   : > { %p1921_p1 = scmp.eq.s32.totalorder %s1515_s13, 0  ;;  %p224_p3 = scmp.eq.s32.totalorder %s1922_s14, 1 }
  0x14   : > { %p932_p5 = scmp.ge.s32.totalorder %s1423_s12, 1  ;;  %p278_p7 = scmp.lt.s32.totalorder %s1423_s12, 3 }
  0x15   : > { %p1526_p4 = por %p1921_p1, %p74_p0  ;;  %p1531_p6 = por %p224_p3, %p74_p0 }
  0x16   : > { %p1537_p9 = pnand %p932_p5, %p278_p7  ;;  %s1425_s18 = smov [#allocation11]  }
  0x17   : > { %s1952_s15 = scalar_select %p1526_p4, 1, 0 }
  0x18   : > { %s1953_s16 = scalar_select %p1531_p6, 1, 0 }
  0x19   : > { %s1955_s17 = scalar_select %p1537_p9, 1, 0 }
  0x1a   : > { %1954 = sst [smem:[#allocation24_spill]] %s1953_s16  ;;  %s301_s19 = sshll.u32 %s1425_s18, 4  ;;  %s1541_s19 = int_to_ptr.vmem [resolvable:$true] %s301_s19 }
  0x1b   : > { %p1051_p10 = pneg %p1537_p9  ;;  %s1553_s21 = sadd.s32 1, %s1423_s12  }
  0x1c   : > { %1957 = sst [smem:[#allocation25_spill]] %s1553_s21  ;;  %s61_s22 = sadd.s32 1, %s1419_s11 }
  0x1d   : > { %p1548_p12 = pnand %p1051_p10, %p1921_p1  ;;  %s58_s23 = ssub.s32 %s1423_s12, %s1553_s21 }
  0x1e   : > { %s1958_s5 = sld [smem:[#allocation29_spill]] }
  0x1f   : > { %s1956_s20 = scalar_select %p1548_p12, 1, 0 }
  0x20   : > { %p1930_p0 = pneg %p1548_p12 }
  0x24   : > { %s1137_s26 = scalar_lea.hbm %s1958_s5, 512 }
  0x25   : > { %p1138_p13 = scmp.ne.s32.totalorder %s1958_s5, %s1137_s26  ;;  %p1144_p7 = scmp.lt.u32.totalorder %s1137_s26, %s1958_s5 }
  0x27   : > { %p1140_p3 = pnand %p1930_p0, %p1138_p13 }
  0x29   : > { %p1141_p5 = pneg %p1140_p3 }
  0x2b   : > { %p1146_p10 = pnand %p1144_p7, %p1141_p5 }
  0x2d   : > { %1149 = shalt.err (!%p1146_p10)
}
  0x2e   : > { %s1150_s24 = scalar_lea.vmem %s1541_s19, 512  ;;  %p1158_p2 = scmp.lt.s32.totalorder %s1541_s19, %s1541_s19 }
  0x2f   : > { %p1151_p11 = scmp.ne.s32.totalorder %s1541_s19, %s1150_s24  ;;  %p1159_p13 = scmp.lt.s32.totalorder %s1150_s24, %s1150_s24 }
  0x31   : > { %p1153_p8 = pnand %p1151_p11, %p1930_p0  ;;  %p1160_p3 = por %p1159_p13, %p1158_p2 }
  0x33   : > { %p1154_p1 = pneg %p1153_p8 }
  0x35   : > { %p1161_p6 = pnand %p1160_p3, %p1154_p1 }
  0x37   : > { %1164 = shalt.err (!%p1161_p6)
}
  0x38   : > { %s1925_s25 = smov 128   ;;  %s1926_s26 = smov 8  }
  0x39   : > { %1057 = dma.hbm_to_vmem [thread:$0]  (!%p1548_p12), %s1958_s5, 512, %s1541_s19, [#allocation10], %s1925_s25, %s1925_s25, %s1926_s26  }
  0x3a   : > { %p59_p1 = scmp.eq.s32.totalorder %s58_s23, 0  ;;  %p68_p2 = scmp.ne.s32.totalorder %s1419_s11, %s1415_s10 }
  0x3b   : > { %p69_p6 = scmp.eq.s32.totalorder %s1423_s12, 0  ;;  %p1077_p8 = scmp.lt.s32.totalorder %s1423_s12, 2 }
  0x3c   : > { %s1593_s29 = scalar_select %p59_p1, %s1419_s11, %s61_s22  }
  0x3d   : > { %p70_p11 = por %p69_p6, %p68_p2  ;;  %p1960_p5 = scmp.eq.s32.totalorder %s1515_s13, 1 }
  0x3e   : > { %1959 = sst [smem:[#allocation26_spill]] %s1593_s29  ;;  %s1927_s14 = sand.u32 1, %s1419_s11  }
  0x3f   : > { %p1597_p7 = por %p1960_p5, %p68_p2  ;;  %s1605_s21 = sshll.u32 %s1927_s14, 3 }
  0x40   : > { %s937_s19 = sshll.u32 %s1423_s12, 7  ;;  %s1963_s1 = sld [smem:[#allocation28_spill]] }
  0x41   : > { %s1961_s18 = scalar_select %p1597_p7, 1, 0 }
  0x42   : > { %s322_s22 = scalar_lea.vmem [#allocation6], %s1605_s21  ;;  %p1616_p10 = pnand %p1077_p8, %p70_p11 }
  0x43   : > { %1962 = sst [smem:[#allocation27_spill]] %s1961_s18  ;;  %s329_s25 = sshll.u32 %s322_s22, 4  ;;  %s1614_s25 = int_to_ptr.vmem [resolvable:$true] %s329_s25 }
  0x44   : > { %s1964_s26 = scalar_select %p1616_p10, 1, 0 }
  0x45   : > { %s1623_s5 = scalar_lea.hbm %s1913_s2, %s937_s19  ;;  %s1965_s23 = sand.u32 1, %s1423_s12  }
  0x46   : > { %s1611_s28 = scalar_lea.hbm %s1963_s1, %s937_s19  ;;  %s1627_s27 = scalar_lea.sflag [#allocation7], %s1965_s23 }
  0x47   : > { %s1165_s29 = scalar_lea.hbm %s1611_s28, 128  ;;  %p1633_p3 = pneg %p1616_p10 }
  0x48   : > { %p1166_p13 = scmp.ne.s32.totalorder %s1611_s28, %s1165_s29  ;;  %s1170_s14 = scalar_lea.hbm %s1963_s1, 256 }
  0x49   : > { %s1966_s22 = scalar_select %p1633_p3, 1, 0 }
  0x4a   : > { %p1168_p1 = pnand %p1633_p3, %p1166_p13  ;;  %p1171_p6 = scmp.lt.u32.totalorder %s1611_s28, %s1963_s1 }
  0x4b   : > { %p1172_p8 = scmp.lt.u32.totalorder %s1170_s14, %s1165_s29  ;;  %p1174_p5 = scmp.lt.u32.totalorder %s1165_s29, %s1611_s28 }
  0x4c   : > { %p1169_p2 = pneg %p1168_p1 }
  0x4d   : > { %p1173_p11 = por %p1172_p8, %p1171_p6 }
  0x4f   : > { %p1175_p0 = por %p1174_p5, %p1173_p11 }
  0x51   : > { %p1176_p7 = pnand %p1175_p0, %p1169_p2 }
  0x53   : > { %1179 = shalt.err (!%p1176_p7)
}
  0x54   : > { %s1180_s23 = scalar_lea.vmem %s1614_s25, 128  ;;  %s1428_s30 = smov [#allocation6]  }
  0x55   : > { %p1181_p13 = scmp.ne.s32.totalorder %s1614_s25, %s1180_s23  ;;  %s1185_s16 = sshll.u32 %s1428_s30, 4  ;;  %s1186_s16 = int_to_ptr.vmem [resolvable:$false] %s1185_s16 }
  0x56   : > { %s1187_s24 = scalar_lea.vmem %s1186_s16, 256  ;;  %p1188_p9 = scmp.lt.s32.totalorder %s1614_s25, %s1186_s16 }
  0x57   : > { %p1183_p1 = pnand %p1181_p13, %p1633_p3  ;;  %p1189_p12 = scmp.lt.s32.totalorder %s1187_s24, %s1180_s23 }
  0x59   : > { %p1184_p4 = pneg %p1183_p1  ;;  %p1190_p6 = por %p1189_p12, %p1188_p9 }
  0x5b   : > { %p1191_p8 = pnand %p1190_p6, %p1184_p4 }
  0x5d   : > { %1194 = shalt.err (!%p1191_p8)
}
  0x5e   : > { %1061 = dma.hbm_to_vmem [thread:$0]  (!%p1616_p10), %s1611_s28, 128, %s1614_s25, %s1627_s27  }
  0x5f   : > { %s1967_s29 = sand.u32 1, %s1419_s11   ;;  %s1429_s19 = smov [#allocation3]  }
  0x60   : > { %s940_s14 = sshll.u32 %s1967_s29, 6  ;;  %s291_s30 = sshll.u32 %s1429_s19, 4  ;;  %s292_s30 = int_to_ptr.vmem [resolvable:$true] %s291_s30 }
  0x61   : > { %s358_s1 = scalar_lea.vmem [#allocation9], %s940_s14  ;;  %s340_s23 = scalar_lea.vmem [#allocation8], %s1605_s21 }
  0x62   : > { %s365_s9 = sshll.u32 %s358_s1, 4  ;;  %s347_s16 = sshll.u32 %s340_s23, 4  ;;  %s1659_s9 = int_to_ptr.vmem [resolvable:$true] %s365_s9  ;;  %s348_s16 = int_to_ptr.vmem [resolvable:$true] %s347_s16 }
  0x63   : > { %s1195_s8 = scalar_lea.hbm %s1911_s0, 128  ;;  %p1968_p9 = scmp.ne.s32.totalorder %s1956_s20, 0 }
  0x64   : > { %p1196_p4 = scmp.ne.s32.totalorder %s1911_s0, %s1195_s8  ;;  %p1202_p2 = scmp.lt.u32.totalorder %s1195_s8, %s1911_s0 }
  0x65   : > { %p1969_p12 = pneg %p1968_p9 }
  0x67   : > { %p1198_p0 = pnand %p1196_p4, %p1969_p12 }
  0x69   : > { %p1199_p7 = pneg %p1198_p0 }
  0x6b   : > { %p1204_p11 = pnand %p1202_p2, %p1199_p7 }
  0x6d   : > { %1207 = shalt.err (!%p1204_p11)
}
  0x6e   : > { %s1208_s1 = scalar_lea.vmem %s292_s30, 128  ;;  %p1970_p13 = pmov %p1969_p12 }
  0x6f   : > { %p1209_p5 = scmp.ne.s32.totalorder %s292_s30, %s1208_s1  ;;  %p1216_p8 = scmp.lt.s32.totalorder %s292_s30, %s292_s30 }
  0x70   : > { %p1217_p10 = scmp.lt.s32.totalorder %s1208_s1, %s1208_s1 }
  0x71   : > { %p1211_p1 = pnand %p1209_p5, %p1970_p13 }
  0x72   : > { %p1218_p3 = por %p1217_p10, %p1216_p8 }
  0x73   : > { %p1212_p6 = pneg %p1211_p1 }
  0x75   : > { %p1219_p4 = pnand %p1218_p3, %p1212_p6 }
  0x77   : > { %1222 = shalt.err (!%p1219_p4)
}
  0x78   : > { %1054 = dma.hbm_to_vmem [thread:$0]  (!%p1968_p9), %s1911_s0, 128, %s292_s30, [#allocation4]  }
  0x79   : > { %s966_s8 = sshll.u32 %s1423_s12, 10  ;;  %s1223_s21 = scalar_lea.hbm %s1623_s5, 128 }
  0x7a   : > { %p1224_p12 = scmp.ne.s32.totalorder %s1623_s5, %s1223_s21  ;;  %p1971_p0 = scmp.ne.s32.totalorder %s1966_s22, 0 }
  0x7b   : > { %s1228_s20 = scalar_lea.hbm %s1913_s2, 256  ;;  %p1229_p7 = scmp.lt.u32.totalorder %s1623_s5, %s1913_s2 }
  0x7c   : > { %p1226_p10 = pnand %p1224_p12, %p1971_p0  ;;  %p1230_p2 = scmp.lt.u32.totalorder %s1228_s20, %s1223_s21 }
  0x7d   : > { %p1232_p5 = scmp.lt.u32.totalorder %s1223_s21, %s1623_s5 }
  0x7e   : > { %p1227_p3 = pneg %p1226_p10  ;;  %p1231_p11 = por %p1230_p2, %p1229_p7 }
  0x80   : > { %p1233_p13 = por %p1232_p5, %p1231_p11 }
  0x82   : > { %p1234_p9 = pnand %p1233_p13, %p1227_p3 }
  0x84   : > { %1237 = shalt.err (!%p1234_p9)
}
  0x85   : > { %s1238_s30 = scalar_lea.vmem %s348_s16, 128  ;;  %s1430_s23 = smov [#allocation8]  }
  0x86   : > { %p1239_p1 = scmp.ne.s32.totalorder %s348_s16, %s1238_s30  ;;  %s1243_s24 = sshll.u32 %s1430_s23, 4  ;;  %s1244_s24 = int_to_ptr.vmem [resolvable:$false] %s1243_s24 }
  0x87   : > { %s1245_s25 = scalar_lea.vmem %s1244_s24, 256  ;;  %p1246_p4 = scmp.lt.s32.totalorder %s348_s16, %s1244_s24 }
  0x88   : > { %p1241_p6 = pnand %p1239_p1, %p1971_p0  ;;  %p1247_p12 = scmp.lt.s32.totalorder %s1245_s25, %s1238_s30 }
  0x8a   : > { %p1242_p8 = pneg %p1241_p6  ;;  %p1248_p10 = por %p1247_p12, %p1246_p4 }
  0x8c   : > { %p1249_p2 = pnand %p1248_p10, %p1242_p8 }
  0x8e   : > { %1252 = shalt.err (!%p1249_p2)
}
  0x8f   : > { %p1972_p7 = scmp.ne.s32.totalorder %s1964_s26, 0  ;;  %s1704_s6 = scalar_lea.hbm %s1914_s3, %s966_s8 }
  0x90   : > { %s1973_s7 = sand.u32 1, %s1423_s12   ;;  %s1253_s18 = scalar_lea.hbm %s1704_s6, 1024 }
  0x91   : > { %1064 = dma.hbm_to_vmem [thread:$0]  (!%p1972_p7), %s1623_s5, 128, %s348_s16, %s1627_s27  }
  0x92   : > { %s1708_s21 = scalar_lea.sflag [#allocation10], %s1973_s7  ;;  %p1254_p3 = scmp.ne.s32.totalorder %s1704_s6, %s1253_s18 }
  0x93   : > { %s1258_s5 = scalar_lea.hbm %s1914_s3, 2048  ;;  %p1259_p13 = scmp.lt.u32.totalorder %s1704_s6, %s1914_s3 }
  0x94   : > { %p1256_p11 = pnand %p1254_p3, %p1971_p0  ;;  %p1260_p9 = scmp.lt.u32.totalorder %s1258_s5, %s1253_s18 }
  0x95   : > { %p1262_p6 = scmp.lt.u32.totalorder %s1253_s18, %s1704_s6 }
  0x96   : > { %p1257_p5 = pneg %p1256_p11  ;;  %p1261_p1 = por %p1260_p9, %p1259_p13 }
  0x98   : > { %p1263_p8 = por %p1262_p6, %p1261_p1 }
  0x9a   : > { %p1264_p4 = pnand %p1263_p8, %p1257_p5 }
  0x9c   : > { %1267 = shalt.err (!%p1264_p4)
}
  0x9d   : > { %s1268_s8 = scalar_lea.vmem %s1659_s9, 1024  ;;  %s1431_s14 = smov [#allocation9]  }
  0x9e   : > { %p1269_p12 = scmp.ne.s32.totalorder %s1659_s9, %s1268_s8  ;;  %s1273_s19 = sshll.u32 %s1431_s14, 4  ;;  %s1274_s19 = int_to_ptr.vmem [resolvable:$false] %s1273_s19 }
  0x9f   : > { %s1275_s30 = scalar_lea.vmem %s1274_s19, 2048  ;;  %p1276_p3 = scmp.lt.s32.totalorder %s1659_s9, %s1274_s19 }
  0xa0   : > { %p1271_p10 = pnand %p1269_p12, %p1971_p0  ;;  %p1277_p11 = scmp.lt.s32.totalorder %s1275_s30, %s1268_s8 }
  0xa2   : > { %p1272_p2 = pneg %p1271_p10  ;;  %p1278_p13 = por %p1277_p11, %p1276_p3 }
  0xa4   : > { %p1279_p9 = pnand %p1278_p13, %p1272_p2 }
  0xa6   : > { %1282 = shalt.err (!%p1279_p9)
}
  0xa7   : > { %s1974_s23 = smov 8   ;;  %s1975_s24 = smov 128  }
  0xa8   : > { %1067 = dma.hbm_to_vmem [thread:$0]  (!%p1972_p7), %s1704_s6, 1024, %s1659_s9, %s1708_s21, %s1975_s24, %s1975_s24, %s1974_s23  }
  0xa9   : > { %p1976_p0 = scmp.ne.s32.totalorder %s1955_s17, 0 }
  0xaa   : > { %p1977_p5 = scmp.eq.s32.totalorder (!%p1976_p0), %s1515_s13, 0 }
  0xab   : > { %383 = sbr.rel (%p1976_p0) target bundleno = 1320 (0x528), region = 48 }
  0xb2   : > { %1382 = dma.done.wait (%p1977_p5), [#allocation4], 128   ;;  %p1978_p1 = pmov %p1977_p5 }
  0xb3   : > { %s1742_s26 = sand.u32 1, %s1515_s13   ;;  %s1745_s22 = sand.u32 1, %s1415_s10  }
  0xb4   : > { %1384 = vsyncadd (%p1978_p1), [#allocation4], 4294967168  ;;  %s1748_s25 = sshll.u32 %s1745_s22, 3  ;;  %s390_s9 = scalar_lea.sflag [#allocation7], %s1742_s26 }
  0xb5   : > { %s393_s17 = scalar_lea.vmem [#allocation6], %s1748_s25  ;;  %p1979_p7 = scmp.ne.s32.totalorder %s1952_s15, 0 }
  0xb7   : > { %1386 = dma.done.wait (%p1979_p7), %s390_s9, 256  }
  0xb8   : > { %1388 = vsyncadd (%p1979_p7), %s390_s9, 4294967040  ;;  %s947_s28 = sshll.u32 %s1745_s22, 6  ;;  %s402_s1 = scalar_lea.vmem [#allocation8], %s1748_s25 }
  0xb9   : > { %s408_s6 = scalar_lea.sflag [#allocation10], %s1742_s26  ;;  %s1759_s7 = scalar_lea.vmem [#allocation9], %s947_s28 }
  0xba   : > { %1390 = dma.done.wait (%p1979_p7), %s408_s6, 1024  }
  0xbb   : > { %1392 = vsyncadd (%p1979_p7), %s408_s6, 4294966272  ;;  %p1980_p6 = pmov %p1978_p1 }
  0xbc   : > { %p1981_p8 = pmov %p1978_p1 }
  0xbd   : > { %1394 = dma.done.wait (%p1980_p6), [#allocation10], 512  }
  0xbe   : > { %1396 = vsyncadd (%p1981_p8), [#allocation10], 4294966784  ;;  %p468_p4 = scmp.lt.s32.totalorder %s1515_s13, 1  ;;  %s458_s15 = scalar_lea.vmem [#allocation12], %s1748_s25 }
  0xbf   : > { %s465_s5 = scalar_lea.vmem [#allocation13], %s1748_s25  ;;  %p1982_p12 = scmp.ne.s32.totalorder %s1515_s13, 0 }
  0xc0   : > { %s1771_s21 = scalar_select %p468_p4, %s1515_s13, 1 }
  0xc1   : > { %474 = sbr.rel (%p1982_p12) target bundleno = 200 (0xc8), region = 72  ;;  %v475_v0 = vld [vmem:[#allocation3] sm:$0xff] (!%p1982_p12)  ;;  %vm476_vm0 = vcmask (!%p1982_p12), 261120  }
  0xc2   : > { %s470_s20 = scalar_lea.vmem %s1915_s4, %s1771_s21  ;;  %477 = vst.msk [vmem:[#allocation2] sm:$0xff] (!%p1982_p12), %vm476_vm0, %v475_v0 }
  0xc8 PF: > { %v479_v1 = vld [vmem:[%s393_s17] sm:$0xff]  ;;  %s1432_s27 = smov 32   ;;  %v1433_v4 = vmov 0.0|0.0   ;;  %v489_v6 = vld [vmem:[%s1759_s7 + $0x10] sm:$0xff]  ;;  %v490_v7 = vld [vmem:[%s1759_s7 + $0x18] sm:$0xff]  ;;  %vm1434_vm1 = vmmov 0  }
  0xc9   : > { %v487_v2 = vld [vmem:[%s1759_s7] sm:$0xff]  ;;  %v488_v3 = vld [vmem:[%s1759_s7 + $0x8] sm:$0xff]  ;;  %482 = vrot.lane.b32.xlu0 %v479_v1, %s1432_s27  ;;  %1011 = vmatprep.subr.bf16.mxu0 %v1433_v4  ;;  %v1435_v8 = vmov 0.0   ;;  %v1015_v9 = vpack.c.bf16 %v490_v7, %v489_v6  ;;  %v480_v10 = vld [vmem:[%s402_s1] sm:$0xff]  ;;  %vm485_vm2 = vcmask 261120   ;;  %vm502_vm3 = vcmask 523264  }
  0xca   : > { %v1012_v5 = vpack.c.bf16 %v488_v3, %v487_v2  ;;  %997 = vmatprep.mubr.msk.f32.mxu0 %vm1434_vm1, %v1435_v8  ;;  %v491_v11 = vld [vmem:[%s1759_s7 + $0x20] sm:$0xff]  ;;  %v492_v12 = vld [vmem:[%s1759_s7 + $0x28] sm:$0xff]  ;;  %584 = vrot.lane.b32.xlu1 %v480_v10, %s1432_s27  ;;  %v493_v14 = vld [vmem:[%s1759_s7 + $0x30] sm:$0xff]  ;;  %s1436_s14 = smov 96   ;;  %s1437_s19 = smov 64  }
  0xcb   : > { %v1018_v13 = vpack.c.bf16 %v492_v12, %v491_v11  ;;  %v494_v15 = vld [vmem:[%s1759_s7 + $0x38] sm:$0xff]  ;;  %v478_v17 = vld [vmem:[#allocation2] sm:$0xff]  ;;  %p955_p10 = scmp.ne.s32.totalorder %s1515_s13, 1 }
  0xcc   : > { %1013 = vmatpush3.bf16.msra.mxu0 %v1012_v5  ;;  %v1021_v16 = vpack.c.bf16 %v494_v15, %v493_v14  ;;  %v952_v20 = vld [vmem:[%s470_s20] ss:$0 sm:$0xff]  ;;  %v619_v40 = vld [vmem:[#allocation11] sm:$0xff] (!%p955_p10)  ;;  %v620_v41 = vld [vmem:[#allocation11 + $0x8] sm:$0xff] (!%p955_p10)  ;;  %v1438_v43 = vmov (!%p955_p10), 0.0|0.0   ;;  %vm1439_vm4 = vmmov (!%p955_p10), 0  }
  0xcd   : > { %1014 = vmatprep.subr.bf16.mxu0 %v1433_v4  ;;  %v621_v42 = vld [vmem:[#allocation11 + $0x10] sm:$0xff] (!%p955_p10)  ;;  %v1024_v44 = vpack.c.bf16 (!%p955_p10), %v620_v41, %v619_v40  ;;  %v622_v45 = vld [vmem:[#allocation11 + $0x18] sm:$0xff] (!%p955_p10)  ;;  %v1440_v46 = vmov (!%p955_p10), 0.0   ;;  %s1983_s24 = sld [smem:[#allocation30_spill]] (!%p955_p10) }
  0xce   : > { %v1027_v47 = vpack.c.bf16 (!%p955_p10), %v622_v45, %v621_v42 }
  0xd0   : > { %1016 = vmatpush3.bf16.msra.mxu0 %v1015_v9 }
  0xd1   : > { %1017 = vmatprep.subr.bf16.mxu0 %v1433_v4 }
  0xd3   : > { %v956_v48 = vld [vmem:[%s1983_s24] ss:$0 sm:$0xff] (!%p955_p10) }
  0xd4   : > { %1019 = vmatpush3.bf16.msra.mxu0 %v1018_v13 }
  0xd5   : > { %1020 = vmatprep.subr.bf16.mxu0 %v1433_v4 }
  0xd8   : > { %1022 = vmatpush3.bf16.msra.mxu0 %v1021_v16 }
  0xd9   : > { %1023 = vmatprep.subr.bf16.mxu0 (!%p955_p10), %v1438_v43 }
 0x13b   : > { %v483_v18 = vpop.permute.xlu0 %482 }
 0x13c   : > { %v486_v19 = vsel %vm485_vm2, %v478_v17, %v483_v18  ;;  %v585_v31 = vpop.permute.xlu1 %584 }
 0x13d   : > { %998 = vmatmul.mubr.msk.f32.vlgmr.msra.gmra.mrb[0].mxu0 %vm502_vm3, %v486_v19 }
 0x13e   : > { %1008 = vmatprep.mubr.msk.f32.mxu0 (!%p955_p10), %vm1439_vm4, %v1440_v46  ;;  %1025 = vmatpush3.bf16.msra.mxu0 (!%p955_p10), %v1024_v44 }
 0x13f   : > { %1026 = vmatprep.subr.bf16.mxu0 (!%p955_p10), %v1438_v43 }
 0x142   : > { %1028 = vmatpush3.bf16.msra.mxu0 (!%p955_p10), %v1027_v47 }
 0x210   : > { %v572_v21 = vpop.f32.mrb[0].mxu0 }
 0x211   : > { %v573_v22 = vadd.f32 %v952_v20, %v572_v21  ;;  %v999_v23 = vpop.f32.mrb[1].mxu0 }
 0x213   : > { %1129 = vtanh.f32 %v573_v22  ;;  %v954_v25 = vmul.f32 -1.442695, %v573_v22 }
 0x215   : > { %1131 = vpow2.f32 %v954_v25 }
 0x21d   : > { %v1130_v24 = vpop.eup %1129 }
 0x21e   : > { %589 = vrot.lane.b32.xlu0 %v1130_v24, %s1432_s27 }
 0x21f   : > { %v1132_v26 = vpop.eup %1131 }
 0x220   : > { %v579_v27 = vadd.f32 1.0, %v1132_v26 }
 0x222   : > { %1133 = vrcp.f32 %v579_v27 }
 0x22c   : > { %v1134_v28 = vpop.eup %1133 }
 0x22d   : > { %v587_v32 = vmul.f32 %v1134_v28, %v585_v31 }
 0x290   : > { %v590_v29 = vpop.permute.xlu0 %589 }
 0x291   : > { %v592_v30 = vmul.f32 %v1134_v28, %v590_v29 }
 0x293   : > { %594 = vrot.lane.b32.xlu1 %v592_v30, %s1432_s27 }
 0x305   : > { %v595_v33 = vpop.permute.xlu1 %594 }
 0x306   : > { %v597_v34 = vadd.f32 %v595_v33, %v587_v32 }
 0x308   : > { %1135 = vtanh.f32 %v597_v34 }
 0x312   : > { %v1136_v35 = vpop.eup %1135 }
 0x313   : > { %600 = vrot.lane.b32.xlu0 %v1136_v35, %s1432_s27 }
 0x317   : > { %610 = vrot.lane.b32.xlu0 %v597_v34, %s1436_s14 }
 0x385   : > { %v601_v36 = vpop.permute.xlu0 %600 }
 0x386   : > { %v603_v37 = vmul.f32 %v1134_v28, %v601_v36 }
 0x388   : > { %605 = vrot.lane.b32.xlu1 %v603_v37, %s1437_s19 }
 0x389   : > { %v611_v38 = vpop.permute.xlu0 %610 }
 0x38a   : > { %613 = vst.msk [vmem:[%s465_s5] sm:$0xff] %vm485_vm2, %v611_v38 }
 0x3f5   : > { %618 = sbr.rel (%p955_p10) target bundleno = 1234 (0x4d2), region = 76 }
 0x3fa   : > { %v606_v39 = vpop.permute.xlu1 %605 }
 0x3fb   : > { %608 = vst.msk [vmem:[%s458_s15] sm:$0xff] %vm485_vm2, %v606_v39  ;;  %614 = vst.msk [vmem:[#allocation2] sm:$0xff] %vm485_vm2, %v606_v39  ;;  %1009 = vmatmul.mubr.msk.f32.vlgmr.msra.gmra.mrb[0].mxu0 (!%p955_p10), %vm485_vm2, %v606_v39 }
 0x4ce   : > { %v698_v49 = vpop.f32.mrb[0].mxu0 }
 0x4cf   : > { %v699_v50 = vadd.f32 %v956_v48, %v698_v49  ;;  %v1010_v51 = vpop.f32.mrb[1].mxu0 }
 0x4d1   : > { %702 = vst [vmem:[#allocation15] sm:$0xff] %v699_v50 }
 0x4d2 PF: > { %s1984_s9 = sld [smem:[#allocation27_spill]]  ;;  %s960_s17 = sshll.u32 %s1515_s13, 7 }
 0x4d3   : > { %s1985_s6 = sld [smem:[#allocation32_spill]]  ;;  %s735_s21 = sshll.u32 %s465_s5, 4  ;;  %s736_s21 = int_to_ptr.vmem [resolvable:$true] %s735_s21 }
 0x4d4   : > { %s709_s18 = scalar_lea.sflag [#allocation14], %s1742_s26  ;;  %s1283_s29 = scalar_lea.vmem %s736_s21, 128 }
 0x4d5   : > { %p1284_p2 = scmp.ne.s32.totalorder %s736_s21, %s1283_s29  ;;  %s1441_s20 = smov [#allocation13]  }
 0x4d6   : > { %s1287_s27 = sshll.u32 %s1441_s20, 4  ;;  %s1288_s27 = int_to_ptr.vmem [resolvable:$false] %s1287_s27 }
 0x4d7   : > { %s1289_s16 = scalar_lea.vmem %s1288_s27, 256  ;;  %p1290_p9 = scmp.lt.s32.totalorder %s736_s21, %s1288_s27 }
 0x4d8   : > { %p1986_p3 = scmp.ne.s32.totalorder %s1984_s9, 0  ;;  %p1291_p0 = scmp.lt.s32.totalorder %s1289_s16, %s1283_s29 }
 0x4d9   : > { %s1820_s7 = scalar_lea.hbm %s1985_s6, %s960_s17 }
 0x4da   : > { %p1285_p11 = pnand %p1284_p2, %p1986_p3  ;;  %p1292_p5 = por %p1291_p0, %p1290_p9 }
 0x4dc   : > { %p1286_p13 = pneg %p1285_p11 }
 0x4de   : > { %p1293_p1 = pnand %p1292_p5, %p1286_p13 }
 0x4e0   : > { %1296 = shalt.err (!%p1293_p1)
}
 0x4e1   : > { %s1297_s26 = scalar_lea.hbm %s1820_s7, 128  ;;  %s1301_s14 = scalar_lea.hbm %s1985_s6, 256 }
 0x4e2   : > { %p1298_p7 = scmp.ne.s32.totalorder %s1820_s7, %s1297_s26  ;;  %p1302_p4 = scmp.lt.u32.totalorder %s1820_s7, %s1985_s6 }
 0x4e3   : > { %p1303_p12 = scmp.lt.u32.totalorder %s1301_s14, %s1297_s26  ;;  %p1305_p2 = scmp.lt.u32.totalorder %s1297_s26, %s1820_s7 }
 0x4e4   : > { %p1299_p6 = pnand %p1298_p7, %p1986_p3 }
 0x4e5   : > { %p1304_p10 = por %p1303_p12, %p1302_p4 }
 0x4e6   : > { %p1300_p8 = pneg %p1299_p6 }
 0x4e7   : > { %p1306_p11 = por %p1305_p2, %p1304_p10 }
 0x4e9   : > { %p1307_p13 = pnand %p1306_p11, %p1300_p8 }
 0x4eb   : > { %1310 = shalt.err (!%p1307_p13)
}
 0x4ec   : > { %1044 = dma.vmem_to_hbm [thread:$0]  (%p1986_p3), %s736_s21, 128, %s1820_s7, %s709_s18  }
 0x4ed   : > { %s1987_s28 = sld [smem:[#allocation31_spill]]  ;;  %s722_s29 = sshll.u32 %s458_s15, 4  ;;  %s723_s29 = int_to_ptr.vmem [resolvable:$true] %s722_s29 }
 0x4ee   : > { %s704_s20 = scalar_lea.sflag [#allocation5], %s1745_s22  ;;  %s1311_s27 = scalar_lea.vmem %s723_s29, 128 }
 0x4ef   : > { %p1312_p9 = scmp.ne.s32.totalorder %s723_s29, %s1311_s27  ;;  %s1442_s16 = smov [#allocation12]  }
 0x4f0   : > { %s1315_s26 = sshll.u32 %s1442_s16, 4  ;;  %s1316_s26 = int_to_ptr.vmem [resolvable:$false] %s1315_s26 }
 0x4f1   : > { %p1313_p0 = pnand %p1312_p9, %p1986_p3  ;;  %s1317_s5 = scalar_lea.vmem %s1316_s26, 256 }
 0x4f2   : > { %p1318_p1 = scmp.lt.s32.totalorder %s723_s29, %s1316_s26  ;;  %p1319_p7 = scmp.lt.s32.totalorder %s1317_s5, %s1311_s27 }
 0x4f3   : > { %s1847_s1 = scalar_lea.hbm %s1987_s28, %s960_s17  ;;  %p1314_p5 = pneg %p1313_p0 }
 0x4f4   : > { %p1320_p6 = por %p1319_p7, %p1318_p1 }
 0x4f6   : > { %p1321_p8 = pnand %p1320_p6, %p1314_p5 }
 0x4f8   : > { %1324 = shalt.err (!%p1321_p8)
}
 0x4f9   : > { %s1325_s22 = scalar_lea.hbm %s1847_s1, 128  ;;  %s1329_s17 = scalar_lea.hbm %s1987_s28, 256 }
 0x4fa   : > { %p1326_p4 = scmp.ne.s32.totalorder %s1847_s1, %s1325_s22  ;;  %p1330_p2 = scmp.lt.u32.totalorder %s1847_s1, %s1987_s28 }
 0x4fb   : > { %p1331_p11 = scmp.lt.u32.totalorder %s1329_s17, %s1325_s22  ;;  %p1333_p9 = scmp.lt.u32.totalorder %s1325_s22, %s1847_s1 }
 0x4fc   : > { %p1327_p12 = pnand %p1326_p4, %p1986_p3 }
 0x4fd   : > { %p1332_p13 = por %p1331_p11, %p1330_p2 }
 0x4fe   : > { %p1328_p10 = pneg %p1327_p12 }
 0x4ff   : > { %p1334_p0 = por %p1333_p9, %p1332_p13 }
 0x501   : > { %p1335_p5 = pnand %p1334_p0, %p1328_p10 }
 0x503   : > { %1338 = shalt.err (!%p1335_p5)
}
 0x504   : > { %1043 = dma.vmem_to_hbm [thread:$0]  (%p1986_p3), %s723_s29, 128, %s1847_s1, %s704_s20  }
 0x505   : > { %s1443_s18 = smov [#allocation15]   ;;  %p1988_p7 = scmp.eq.s32.totalorder %s1515_s13, 1 }
 0x506   : > { %s746_s8 = sshll.u32 %s1443_s18, 4  ;;  %s747_s8 = int_to_ptr.vmem [resolvable:$true] %s746_s8 }
 0x507   : > { %s1339_s14 = scalar_lea.vmem %s747_s8, 128  ;;  %p1346_p4 = scmp.lt.s32.totalorder %s747_s8, %s747_s8 }
 0x508   : > { %p1340_p1 = scmp.ne.s32.totalorder %s747_s8, %s1339_s14  ;;  %p1347_p12 = scmp.lt.s32.totalorder %s1339_s14, %s1339_s14 }
 0x50a   : > { %p1341_p6 = pnand %p1340_p1, %p1988_p7  ;;  %p1348_p2 = por %p1347_p12, %p1346_p4 }
 0x50c   : > { %p1342_p8 = pneg %p1341_p6 }
 0x50e   : > { %p1349_p11 = pnand %p1348_p2, %p1342_p8 }
 0x510   : > { %1352 = shalt.err (!%p1349_p11)
}
 0x511   : > { %s1989_s23 = sld [smem:[#allocation33_spill]]  ;;  %p1990_p10 = pmov %p1988_p7 }
 0x517   : > { %s1353_s9 = scalar_lea.hbm %s1989_s23, 128 }
 0x518   : > { %p1354_p3 = scmp.ne.s32.totalorder %s1989_s23, %s1353_s9  ;;  %p1359_p0 = scmp.lt.u32.totalorder %s1353_s9, %s1989_s23 }
 0x51a   : > { %p1355_p13 = pnand %p1354_p3, %p1990_p10 }
 0x51c   : > { %p1356_p9 = pneg %p1355_p13 }
 0x51e   : > { %p1361_p5 = pnand %p1359_p0, %p1356_p9 }
 0x520   : > { %1364 = shalt.err (!%p1361_p5)
}
 0x521   : > { %p1991_p1 = pmov %p1988_p7 }
 0x523   : > { %1046 = dma.vmem_to_hbm [thread:$0]  (%p1991_p1), %s747_s8, 128, %s1989_s23, [#allocation14]  }
 0x524   : > { %p1992_p7 = pmov %p1991_p1 }
 0x525   : > { %p1993_p6 = pmov %p1991_p1 }
 0x526   : > { %1398 = dma.done.wait (%p1992_p7), [#allocation14], 128  }
 0x527   : > { %1400 = vsyncadd (%p1993_p6), [#allocation14], 4294967168 }
 0x528 PF: > { %s1994_s26 = sld [smem:[#allocation23_spill]]  ;;  %s1995_s5 = sld [smem:[#allocation24_spill]] }
 0x529   : > { %p1997_p4 = scmp.ge.s32.totalorder %s1423_s12, 2 }
 0x52e   : > { %s762_s22 = sand.u32 1, %s1994_s26   ;;  %p1996_p8 = scmp.ne.s32.totalorder %s1995_s5, 0 }
 0x52f   : > { %s763_s25 = scalar_lea.sflag [#allocation5], %s762_s22 }
 0x530   : > { %p1069_p12 = pnand %p1997_p4, %p1996_p8 }
 0x532   : > { %1402 = dma.done.wait (!%p1069_p12), %s763_s25, 128  }
 0x533   : > { %1404 = vsyncadd (!%p1069_p12), %s763_s25, 4294967168  ;;  %s1998_s15 = sadd.s32 4294967294, %s1423_s12  }
 0x534   : > { %s771_s17 = sand.u32 1, %s1998_s15  }
 0x535   : > { %s772_s7 = scalar_lea.sflag [#allocation14], %s771_s17 }
 0x536   : > { %1406 = dma.done.wait (!%p1069_p12), %s772_s7, 128  }
 0x537   : > { %1408 = vsyncadd (!%p1069_p12), %s772_s7, 4294967168  ;;  %s1999_s12 = sld [smem:[#allocation25_spill]]  ;;  %s2000_s13 = sld [smem:[#allocation26_spill]] }
 0x538   : > { %s2001_s30 = smov %s1415_s10  ;;  %s2002_s10 = smov %s1419_s11 }
 0x53d   : > { %p30_p2 = scmp.ge.s32.totalorder %s1999_s12, 4   ;;  %s2003_s11 = smov %s2000_s13 }
 0x53f   :  { %32 = sbr.rel (!%p30_p2) target bundleno = 17 (0x11), region = 162 }
 0x546   :  { %777 = vsyncpa [#allocation4], 1 }
 0x547   :  { %779 = vsyncpa [#allocation4 + $0x1], 1 }
 0x548   :  { %780 = vsyncpa [#allocation7], 1 }
 0x549   :  { %782 = vsyncpa [#allocation7 + $0x1], 1 }
 0x54a   :  { %783 = vsyncpa [#allocation10], 1 }
 0x54b   :  { %785 = vsyncpa [#allocation10 + $0x1], 1 }
 0x54c   :  { %786 = vsyncpa [#allocation5], 1 }
 0x54d   :  { %788 = vsyncpa [#allocation5 + $0x1], 1 }
 0x54e   :  { %789 = vsyncpa [#allocation14], 1 }
 0x54f   :  { %791 = vsyncpa [#allocation14 + $0x1], 1 }

</bundles_post_ra>
